<compile_context>
chip_gen: v6e
topology: v6e:2x2x1
jax: 0.10.0
libtpu: 0.0.40
codegen_flags: <defaults>
</compile_context>

<pallas_src>
import numpy as np
import jax
import jax.numpy as jnp
from jax.experimental import pallas as pl
from jax.experimental.pallas import tpu as pltpu


_EPS = 1e-12  # matches torch.nn.functional.normalize default eps
_LANE = 128


def camera_opt_kernel(cam_ref, pd_ref, out_ref):
    """cam_ref: (16, SUB, 128) f32, pd_ref: (9, SUB, 128) f32, out_ref: (16, SUB, 128) f32.

    Row r of cam/out holds element (r // 4, r % 4) of the 4x4 matrix; pd rows
    0..2 = dx, rows 3..8 = 6D rotation delta.  Every `ref[k]` is a dense
    (SUB, 128) tile, so all math below vectorizes at full vreg occupancy.
    """
    # dx = pose_deltas[..., :3]
    dx = [pd_ref[k] for k in range(3)]

    # d6 = drot + identity([1, 0, 0, 0, 1, 0]); only two components need the +1.
    a1 = [pd_ref[3] + 1.0, pd_ref[4], pd_ref[5]]
    a2 = [pd_ref[6], pd_ref[7] + 1.0, pd_ref[8]]

    # b1 = normalize(a1) = a1 / max(||a1||, eps) = a1 * rsqrt(max(||a1||^2, eps^2))
    sq1 = a1[0] * a1[0] + a1[1] * a1[1] + a1[2] * a1[2]
    inv1 = jax.lax.rsqrt(jnp.maximum(sq1, _EPS * _EPS))   # EUP, frees VALU slots
    b1 = [a1[i] * inv1 for i in range(3)]

    # b2 = normalize(a2 - <b1, a2> * b1)
    dot12 = b1[0] * a2[0] + b1[1] * a2[1] + b1[2] * a2[2]
    u2 = [a2[i] - dot12 * b1[i] for i in range(3)]
    sq2 = u2[0] * u2[0] + u2[1] * u2[1] + u2[2] * u2[2]
    inv2 = jax.lax.rsqrt(jnp.maximum(sq2, _EPS * _EPS))
    b2 = [u2[i] * inv2 for i in range(3)]

    # b3 = cross(b1, b2)
    b3 = [
        b1[1] * b2[2] - b1[2] * b2[1],
        b1[2] * b2[0] - b1[0] * b2[2],
        b1[0] * b2[1] - b1[1] * b2[0],
    ]

    # rot[k][j] = (row k of the rotation matrix)[j]
    rot = [b1, b2, b3]

    # out[i, j] = sum_k cam[i, k] * T[k, j]
    #   T[:3, :3] = rot, T[:3, 3] = dx, T[3, :] = [0, 0, 0, 1]
    # Store each output row as soon as it is computed (short live ranges, no stack).
    for i in range(4):
        ci = [cam_ref[i * 4 + k] for k in range(4)]
        for j in range(3):
            out_ref[i * 4 + j] = ci[0] * rot[0][j] + ci[1] * rot[1][j] + ci[2] * rot[2][j]
        out_ref[i * 4 + 3] = ci[0] * dx[0] + ci[1] * dx[1] + ci[2] * dx[2] + ci[3]


def camera_opt_forward(camtoworlds, embed_ids, embed_weight, *, sub_tile=64):
    """Pallas-backed forward of CameraOptModule.

    camtoworlds: (..., 4, 4) float32
    embed_ids:   (...,)      int32
    embed_weight:(n, 9)      float32   (the nn.Embedding table)
    sub_tile:    max sublane rows per grid step (tile = sub_tile * 128 cameras).
                 64 -> ~1.3 MiB/block (2.6 MiB double-buffered), safe on v7x VMEM.
    """
    batch_dims = camtoworlds.shape[:-2]
    assert camtoworlds.shape[:-2] == embed_ids.shape
    B = int(np.prod(batch_dims)) if len(batch_dims) > 0 else 1

    # Tile geometry: batch packed as (sublane, lane) tiles of (sub, 128).
    sub = min(sub_tile, max(8, ((-(-B // _LANE)) + 7) // 8 * 8))  # multiple of 8
    tb = sub * _LANE                                              # cameras per grid step
    bp = -(-B // tb) * tb                                         # pad B to a tile multiple
    nb = bp // _LANE                                              # total sublane rows
    grid = (bp // tb,)

    # Glue kept in XLA: embedding gather (data-dependent) + AoS->SoA relayout.
    # TODO(synk): if the surrounding pipeline can hold camtoworlds in (16, B) SoA
    # layout, these boundary transposes disappear (~2x less HBM traffic end-to-end).
    cam_flat = camtoworlds.reshape(B, 16).astype(jnp.float32)              # (B, 16)
    pd_flat = jnp.take(embed_weight.astype(jnp.float32),
                       embed_ids.reshape(B), axis=0)                       # (B, 9)
    if bp != B:
        cam_flat = jnp.pad(cam_flat, ((0, bp - B), (0, 0)))
        pd_flat = jnp.pad(pd_flat, ((0, bp - B), (0, 0)))

    cam_soa = cam_flat.T.reshape(16, nb, _LANE)                            # (16, nb, 128)
    pd_soa = pd_flat.T.reshape(9, nb, _LANE)                               # (9,  nb, 128)

    out_soa = pl.pallas_call(
        camera_opt_kernel,
        out_shape=jax.ShapeDtypeStruct((16, nb, _LANE), jnp.float32),
        grid=grid,
        in_specs=[
            pl.BlockSpec((16, sub, _LANE), lambda i: (0, i, 0)),
            pl.BlockSpec((9, sub, _LANE), lambda i: (0, i, 0)),
        ],
        out_specs=pl.BlockSpec((16, sub, _LANE), lambda i: (0, i, 0)),
        compiler_params=pltpu.CompilerParams(
            dimension_semantics=("parallel",),  # shards the batch axis across TCs on v7x
        ),
    )(cam_soa, pd_soa)

    out = out_soa.reshape(16, bp).T[:B]                                    # (B, 16)
    return out.reshape(*batch_dims, 4, 4).astype(camtoworlds.dtype)


def camera_opt_reference(camtoworlds, embed_ids, embed_weight):
    """Pure-JAX reference mirroring the PyTorch module."""
    pd = jnp.take(embed_weight, embed_ids, axis=0)
    dx, drot = pd[..., :3], pd[..., 3:]
    identity = jnp.array([1.0, 0.0, 0.0, 0.0, 1.0, 0.0], jnp.float32)
    d6 = drot + identity
    a1, a2 = d6[..., :3], d6[..., 3:]
    b1 = a1 / jnp.maximum(jnp.linalg.norm(a1, axis=-1, keepdims=True), _EPS)
    b2 = a2 - jnp.sum(b1 * a2, axis=-1, keepdims=True) * b1
    b2 = b2 / jnp.maximum(jnp.linalg.norm(b2, axis=-1, keepdims=True), _EPS)
    b3 = jnp.cross(b1, b2)
    rot = jnp.stack([b1, b2, b3], axis=-2)
    batch_dims = camtoworlds.shape[:-2]
    T = jnp.broadcast_to(jnp.eye(4, dtype=jnp.float32), (*batch_dims, 4, 4))
    T = T.at[..., :3, :3].set(rot).at[..., :3, 3].set(dx)
    return jnp.matmul(camtoworlds, T)


if __name__ == "__main__":
    key = jax.random.PRNGKey(0)
    k1, k2, k3, k4, k5 = jax.random.split(key, 5)

    n_cameras = 6                  # CameraOptModule(n=6)

    # Deterministic "random_init(std=0.05)" of the embedding table.
    embed_weight = 0.05 * jax.random.normal(k1, (n_cameras, 9), dtype=jnp.float32)

    # Test 1: small batch (2, 4) -> B = 8, single grid step with padding.
    batch_dims = (2, 4)
    camtoworlds = jax.random.normal(k2, (*batch_dims, 4, 4), dtype=jnp.float32)
    embed_ids = jax.random.randint(k3, batch_dims, 0, n_cameras, dtype=jnp.int32)

    out = jax.block_until_ready(camera_opt_forward(camtoworlds, embed_ids, embed_weight))
    ref = jax.block_until_ready(camera_opt_reference(camtoworlds, embed_ids, embed_weight))
    assert out.shape == (*batch_dims, 4, 4)
    np.testing.assert_allclose(np.asarray(out), np.asarray(ref), rtol=1e-5, atol=1e-5)

    # Test 2: non-tile-aligned batch with a multi-step grid (exercises padding + grid).
    batch_dims2 = (5, 250)         # B = 1250 -> sub_tile=8 => tb=1024, grid=(2,)
    camtoworlds2 = jax.random.normal(k4, (*batch_dims2, 4, 4), dtype=jnp.float32)
    embed_ids2 = jax.random.randint(k5, batch_dims2, 0, n_cameras, dtype=jnp.int32)

    out2 = jax.block_until_ready(
        camera_opt_forward(camtoworlds2, embed_ids2, embed_weight, sub_tile=8))
    ref2 = jax.block_until_ready(
        camera_opt_reference(camtoworlds2, embed_ids2, embed_weight))
    assert out2.shape == (*batch_dims2, 4, 4)
    np.testing.assert_allclose(np.asarray(out2), np.asarray(ref2), rtol=1e-5, atol=1e-5)

    print("KERNEL_OK")
</pallas_src>

<mosaic_0001>
module attributes {stable_mosaic.version = 11 : i64} {
  func.func @camera_opt_kernel(%arg0: i32, %arg1: memref<16x8x128xf32, #tpu.memory_space<vmem>>, %arg2: memref<9x8x128xf32, #tpu.memory_space<vmem>>, %arg3: memref<16x8x128xf32, #tpu.memory_space<vmem>>) attributes {dimension_semantics = [#tpu.dimension_semantics<parallel>], iteration_bounds = array<i64: 1>, scalar_prefetch = 0 : i64, scratch_operands = 0 : i64, tpu.core_type = #tpu.core_type<tc>, window_params = [{transform_indices = @transform_0, window_bounds = array<i64: 16, 8, 128>}, {transform_indices = @transform_1, window_bounds = array<i64: 9, 8, 128>}, {transform_indices = @transform_2, window_bounds = array<i64: 16, 8, 128>}]} {
    %c0 = arith.constant 0 : index
    %c0_0 = arith.constant 0 : index
    %c0_1 = arith.constant 0 : index
    %0 = vector.load %arg2[%c0, %c0_0, %c0_1] : memref<9x8x128xf32, #tpu.memory_space<vmem>>, vector<1x8x128xf32>
    %1 = vector.shape_cast %0 : vector<1x8x128xf32> to vector<8x128xf32>
    %c1 = arith.constant 1 : index
    %c0_2 = arith.constant 0 : index
    %c0_3 = arith.constant 0 : index
    %2 = vector.load %arg2[%c1, %c0_2, %c0_3] : memref<9x8x128xf32, #tpu.memory_space<vmem>>, vector<1x8x128xf32>
    %3 = vector.shape_cast %2 : vector<1x8x128xf32> to vector<8x128xf32>
    %c2 = arith.constant 2 : index
    %c0_4 = arith.constant 0 : index
    %c0_5 = arith.constant 0 : index
    %4 = vector.load %arg2[%c2, %c0_4, %c0_5] : memref<9x8x128xf32, #tpu.memory_space<vmem>>, vector<1x8x128xf32>
    %5 = vector.shape_cast %4 : vector<1x8x128xf32> to vector<8x128xf32>
    %c3 = arith.constant 3 : index
    %c0_6 = arith.constant 0 : index
    %c0_7 = arith.constant 0 : index
    %6 = vector.load %arg2[%c3, %c0_6, %c0_7] : memref<9x8x128xf32, #tpu.memory_space<vmem>>, vector<1x8x128xf32>
    %7 = vector.shape_cast %6 : vector<1x8x128xf32> to vector<8x128xf32>
    %cst = arith.constant 1.000000e+00 : f32
    %8 = vector.broadcast %cst : f32 to vector<8x128xf32>
    %9 = arith.addf %7, %8 : vector<8x128xf32>
    %c4 = arith.constant 4 : index
    %c0_8 = arith.constant 0 : index
    %c0_9 = arith.constant 0 : index
    %10 = vector.load %arg2[%c4, %c0_8, %c0_9] : memref<9x8x128xf32, #tpu.memory_space<vmem>>, vector<1x8x128xf32>
    %11 = vector.shape_cast %10 : vector<1x8x128xf32> to vector<8x128xf32>
    %c5 = arith.constant 5 : index
    %c0_10 = arith.constant 0 : index
    %c0_11 = arith.constant 0 : index
    %12 = vector.load %arg2[%c5, %c0_10, %c0_11] : memref<9x8x128xf32, #tpu.memory_space<vmem>>, vector<1x8x128xf32>
    %13 = vector.shape_cast %12 : vector<1x8x128xf32> to vector<8x128xf32>
    %c6 = arith.constant 6 : index
    %c0_12 = arith.constant 0 : index
    %c0_13 = arith.constant 0 : index
    %14 = vector.load %arg2[%c6, %c0_12, %c0_13] : memref<9x8x128xf32, #tpu.memory_space<vmem>>, vector<1x8x128xf32>
    %15 = vector.shape_cast %14 : vector<1x8x128xf32> to vector<8x128xf32>
    %c7 = arith.constant 7 : index
    %c0_14 = arith.constant 0 : index
    %c0_15 = arith.constant 0 : index
    %16 = vector.load %arg2[%c7, %c0_14, %c0_15] : memref<9x8x128xf32, #tpu.memory_space<vmem>>, vector<1x8x128xf32>
    %17 = vector.shape_cast %16 : vector<1x8x128xf32> to vector<8x128xf32>
    %cst_16 = arith.constant 1.000000e+00 : f32
    %18 = vector.broadcast %cst_16 : f32 to vector<8x128xf32>
    %19 = arith.addf %17, %18 : vector<8x128xf32>
    %c8 = arith.constant 8 : index
    %c0_17 = arith.constant 0 : index
    %c0_18 = arith.constant 0 : index
    %20 = vector.load %arg2[%c8, %c0_17, %c0_18] : memref<9x8x128xf32, #tpu.memory_space<vmem>>, vector<1x8x128xf32>
    %21 = vector.shape_cast %20 : vector<1x8x128xf32> to vector<8x128xf32>
    %22 = arith.mulf %9, %9 : vector<8x128xf32>
    %23 = arith.mulf %11, %11 : vector<8x128xf32>
    %24 = arith.addf %22, %23 : vector<8x128xf32>
    %25 = arith.mulf %13, %13 : vector<8x128xf32>
    %26 = arith.addf %24, %25 : vector<8x128xf32>
    %cst_19 = arith.constant 1.000000e-24 : f32
    %27 = vector.broadcast %cst_19 : f32 to vector<8x128xf32>
    %28 = arith.maximumf %26, %27 : vector<8x128xf32>
    %29 = math.rsqrt %28 : vector<8x128xf32>
    %30 = arith.mulf %9, %29 : vector<8x128xf32>
    %31 = arith.mulf %11, %29 : vector<8x128xf32>
    %32 = arith.mulf %13, %29 : vector<8x128xf32>
    %33 = arith.mulf %30, %15 : vector<8x128xf32>
    %34 = arith.mulf %31, %19 : vector<8x128xf32>
    %35 = arith.addf %33, %34 : vector<8x128xf32>
    %36 = arith.mulf %32, %21 : vector<8x128xf32>
    %37 = arith.addf %35, %36 : vector<8x128xf32>
    %38 = arith.mulf %37, %30 : vector<8x128xf32>
    %39 = arith.subf %15, %38 : vector<8x128xf32>
    %40 = arith.mulf %37, %31 : vector<8x128xf32>
    %41 = arith.subf %19, %40 : vector<8x128xf32>
    %42 = arith.mulf %37, %32 : vector<8x128xf32>
    %43 = arith.subf %21, %42 : vector<8x128xf32>
    %44 = arith.mulf %39, %39 : vector<8x128xf32>
    %45 = arith.mulf %41, %41 : vector<8x128xf32>
    %46 = arith.addf %44, %45 : vector<8x128xf32>
    %47 = arith.mulf %43, %43 : vector<8x128xf32>
    %48 = arith.addf %46, %47 : vector<8x128xf32>
    %cst_20 = arith.constant 1.000000e-24 : f32
    %49 = vector.broadcast %cst_20 : f32 to vector<8x128xf32>
    %50 = arith.maximumf %48, %49 : vector<8x128xf32>
    %51 = math.rsqrt %50 : vector<8x128xf32>
    %52 = arith.mulf %39, %51 : vector<8x128xf32>
    %53 = arith.mulf %41, %51 : vector<8x128xf32>
    %54 = arith.mulf %43, %51 : vector<8x128xf32>
    %55 = arith.mulf %31, %54 : vector<8x128xf32>
    %56 = arith.mulf %32, %53 : vector<8x128xf32>
    %57 = arith.subf %55, %56 : vector<8x128xf32>
    %58 = arith.mulf %32, %52 : vector<8x128xf32>
    %59 = arith.mulf %30, %54 : vector<8x128xf32>
    %60 = arith.subf %58, %59 : vector<8x128xf32>
    %61 = arith.mulf %30, %53 : vector<8x128xf32>
    %62 = arith.mulf %31, %52 : vector<8x128xf32>
    %63 = arith.subf %61, %62 : vector<8x128xf32>
    %c0_21 = arith.constant 0 : index
    %c0_22 = arith.constant 0 : index
    %c0_23 = arith.constant 0 : index
    %64 = vector.load %arg1[%c0_21, %c0_22, %c0_23] : memref<16x8x128xf32, #tpu.memory_space<vmem>>, vector<1x8x128xf32>
    %65 = vector.shape_cast %64 : vector<1x8x128xf32> to vector<8x128xf32>
    %c1_24 = arith.constant 1 : index
    %c0_25 = arith.constant 0 : index
    %c0_26 = arith.constant 0 : index
    %66 = vector.load %arg1[%c1_24, %c0_25, %c0_26] : memref<16x8x128xf32, #tpu.memory_space<vmem>>, vector<1x8x128xf32>
    %67 = vector.shape_cast %66 : vector<1x8x128xf32> to vector<8x128xf32>
    %c2_27 = arith.constant 2 : index
    %c0_28 = arith.constant 0 : index
    %c0_29 = arith.constant 0 : index
    %68 = vector.load %arg1[%c2_27, %c0_28, %c0_29] : memref<16x8x128xf32, #tpu.memory_space<vmem>>, vector<1x8x128xf32>
    %69 = vector.shape_cast %68 : vector<1x8x128xf32> to vector<8x128xf32>
    %c3_30 = arith.constant 3 : index
    %c0_31 = arith.constant 0 : index
    %c0_32 = arith.constant 0 : index
    %70 = vector.load %arg1[%c3_30, %c0_31, %c0_32] : memref<16x8x128xf32, #tpu.memory_space<vmem>>, vector<1x8x128xf32>
    %71 = vector.shape_cast %70 : vector<1x8x128xf32> to vector<8x128xf32>
    %72 = arith.mulf %65, %30 : vector<8x128xf32>
    %73 = arith.mulf %67, %52 : vector<8x128xf32>
    %74 = arith.addf %72, %73 : vector<8x128xf32>
    %75 = arith.mulf %69, %57 : vector<8x128xf32>
    %76 = arith.addf %74, %75 : vector<8x128xf32>
    %c0_33 = arith.constant 0 : index
    %c0_34 = arith.constant 0 : index
    %c0_35 = arith.constant 0 : index
    %77 = vector.load %arg3[%c0_33, %c0_34, %c0_35] : memref<16x8x128xf32, #tpu.memory_space<vmem>>, vector<1x8x128xf32>
    %78 = vector.shape_cast %77 : vector<1x8x128xf32> to vector<8x128xf32>
    %79 = vector.shape_cast %76 : vector<8x128xf32> to vector<1x8x128xf32>
    tpu.vector_store %arg3[%c0_33, %c0_34, %c0_35], %79 {strides = array<i32>} : memref<16x8x128xf32, #tpu.memory_space<vmem>>, vector<1x8x128xf32>,
    %80 = arith.mulf %65, %31 : vector<8x128xf32>
    %81 = arith.mulf %67, %53 : vector<8x128xf32>
    %82 = arith.addf %80, %81 : vector<8x128xf32>
    %83 = arith.mulf %69, %60 : vector<8x128xf32>
    %84 = arith.addf %82, %83 : vector<8x128xf32>
    %c1_36 = arith.constant 1 : index
    %c0_37 = arith.constant 0 : index
    %c0_38 = arith.constant 0 : index
    %85 = vector.load %arg3[%c1_36, %c0_37, %c0_38] : memref<16x8x128xf32, #tpu.memory_space<vmem>>, vector<1x8x128xf32>
    %86 = vector.shape_cast %85 : vector<1x8x128xf32> to vector<8x128xf32>
    %87 = vector.shape_cast %84 : vector<8x128xf32> to vector<1x8x128xf32>
    tpu.vector_store %arg3[%c1_36, %c0_37, %c0_38], %87 {strides = array<i32>} : memref<16x8x128xf32, #tpu.memory_space<vmem>>, vector<1x8x128xf32>,
    %88 = arith.mulf %65, %32 : vector<8x128xf32>
    %89 = arith.mulf %67, %54 : vector<8x128xf32>
    %90 = arith.addf %88, %89 : vector<8x128xf32>
    %91 = arith.mulf %69, %63 : vector<8x128xf32>
    %92 = arith.addf %90, %91 : vector<8x128xf32>
    %c2_39 = arith.constant 2 : index
    %c0_40 = arith.constant 0 : index
    %c0_41 = arith.constant 0 : index
    %93 = vector.load %arg3[%c2_39, %c0_40, %c0_41] : memref<16x8x128xf32, #tpu.memory_space<vmem>>, vector<1x8x128xf32>
    %94 = vector.shape_cast %93 : vector<1x8x128xf32> to vector<8x128xf32>
    %95 = vector.shape_cast %92 : vector<8x128xf32> to vector<1x8x128xf32>
    tpu.vector_store %arg3[%c2_39, %c0_40, %c0_41], %95 {strides = array<i32>} : memref<16x8x128xf32, #tpu.memory_space<vmem>>, vector<1x8x128xf32>,
    %96 = arith.mulf %65, %1 : vector<8x128xf32>
    %97 = arith.mulf %67, %3 : vector<8x128xf32>
    %98 = arith.addf %96, %97 : vector<8x128xf32>
    %99 = arith.mulf %69, %5 : vector<8x128xf32>
    %100 = arith.addf %98, %99 : vector<8x128xf32>
    %101 = arith.addf %100, %71 : vector<8x128xf32>
    %c3_42 = arith.constant 3 : index
    %c0_43 = arith.constant 0 : index
    %c0_44 = arith.constant 0 : index
    %102 = vector.load %arg3[%c3_42, %c0_43, %c0_44] : memref<16x8x128xf32, #tpu.memory_space<vmem>>, vector<1x8x128xf32>
    %103 = vector.shape_cast %102 : vector<1x8x128xf32> to vector<8x128xf32>
    %104 = vector.shape_cast %101 : vector<8x128xf32> to vector<1x8x128xf32>
    tpu.vector_store %arg3[%c3_42, %c0_43, %c0_44], %104 {strides = array<i32>} : memref<16x8x128xf32, #tpu.memory_space<vmem>>, vector<1x8x128xf32>,
    %c4_45 = arith.constant 4 : index
    %c0_46 = arith.constant 0 : index
    %c0_47 = arith.constant 0 : index
    %105 = vector.load %arg1[%c4_45, %c0_46, %c0_47] : memref<16x8x128xf32, #tpu.memory_space<vmem>>, vector<1x8x128xf32>
    %106 = vector.shape_cast %105 : vector<1x8x128xf32> to vector<8x128xf32>
    %c5_48 = arith.constant 5 : index
    %c0_49 = arith.constant 0 : index
    %c0_50 = arith.constant 0 : index
    %107 = vector.load %arg1[%c5_48, %c0_49, %c0_50] : memref<16x8x128xf32, #tpu.memory_space<vmem>>, vector<1x8x128xf32>
    %108 = vector.shape_cast %107 : vector<1x8x128xf32> to vector<8x128xf32>
    %c6_51 = arith.constant 6 : index
    %c0_52 = arith.constant 0 : index
    %c0_53 = arith.constant 0 : index
    %109 = vector.load %arg1[%c6_51, %c0_52, %c0_53] : memref<16x8x128xf32, #tpu.memory_space<vmem>>, vector<1x8x128xf32>
    %110 = vector.shape_cast %109 : vector<1x8x128xf32> to vector<8x128xf32>
    %c7_54 = arith.constant 7 : index
    %c0_55 = arith.constant 0 : index
    %c0_56 = arith.constant 0 : index
    %111 = vector.load %arg1[%c7_54, %c0_55, %c0_56] : memref<16x8x128xf32, #tpu.memory_space<vmem>>, vector<1x8x128xf32>
    %112 = vector.shape_cast %111 : vector<1x8x128xf32> to vector<8x128xf32>
    %113 = arith.mulf %106, %30 : vector<8x128xf32>
    %114 = arith.mulf %108, %52 : vector<8x128xf32>
    %115 = arith.addf %113, %114 : vector<8x128xf32>
    %116 = arith.mulf %110, %57 : vector<8x128xf32>
    %117 = arith.addf %115, %116 : vector<8x128xf32>
    %c4_57 = arith.constant 4 : index
    %c0_58 = arith.constant 0 : index
    %c0_59 = arith.constant 0 : index
    %118 = vector.load %arg3[%c4_57, %c0_58, %c0_59] : memref<16x8x128xf32, #tpu.memory_space<vmem>>, vector<1x8x128xf32>
    %119 = vector.shape_cast %118 : vector<1x8x128xf32> to vector<8x128xf32>
    %120 = vector.shape_cast %117 : vector<8x128xf32> to vector<1x8x128xf32>
    tpu.vector_store %arg3[%c4_57, %c0_58, %c0_59], %120 {strides = array<i32>} : memref<16x8x128xf32, #tpu.memory_space<vmem>>, vector<1x8x128xf32>,
    %121 = arith.mulf %106, %31 : vector<8x128xf32>
    %122 = arith.mulf %108, %53 : vector<8x128xf32>
    %123 = arith.addf %121, %122 : vector<8x128xf32>
    %124 = arith.mulf %110, %60 : vector<8x128xf32>
    %125 = arith.addf %123, %124 : vector<8x128xf32>
    %c5_60 = arith.constant 5 : index
    %c0_61 = arith.constant 0 : index
    %c0_62 = arith.constant 0 : index
    %126 = vector.load %arg3[%c5_60, %c0_61, %c0_62] : memref<16x8x128xf32, #tpu.memory_space<vmem>>, vector<1x8x128xf32>
    %127 = vector.shape_cast %126 : vector<1x8x128xf32> to vector<8x128xf32>
    %128 = vector.shape_cast %125 : vector<8x128xf32> to vector<1x8x128xf32>
    tpu.vector_store %arg3[%c5_60, %c0_61, %c0_62], %128 {strides = array<i32>} : memref<16x8x128xf32, #tpu.memory_space<vmem>>, vector<1x8x128xf32>,
    %129 = arith.mulf %106, %32 : vector<8x128xf32>
    %130 = arith.mulf %108, %54 : vector<8x128xf32>
    %131 = arith.addf %129, %130 : vector<8x128xf32>
    %132 = arith.mulf %110, %63 : vector<8x128xf32>
    %133 = arith.addf %131, %132 : vector<8x128xf32>
    %c6_63 = arith.constant 6 : index
    %c0_64 = arith.constant 0 : index
    %c0_65 = arith.constant 0 : index
    %134 = vector.load %arg3[%c6_63, %c0_64, %c0_65] : memref<16x8x128xf32, #tpu.memory_space<vmem>>, vector<1x8x128xf32>
    %135 = vector.shape_cast %134 : vector<1x8x128xf32> to vector<8x128xf32>
    %136 = vector.shape_cast %133 : vector<8x128xf32> to vector<1x8x128xf32>
    tpu.vector_store %arg3[%c6_63, %c0_64, %c0_65], %136 {strides = array<i32>} : memref<16x8x128xf32, #tpu.memory_space<vmem>>, vector<1x8x128xf32>,
    %137 = arith.mulf %106, %1 : vector<8x128xf32>
    %138 = arith.mulf %108, %3 : vector<8x128xf32>
    %139 = arith.addf %137, %138 : vector<8x128xf32>
    %140 = arith.mulf %110, %5 : vector<8x128xf32>
    %141 = arith.addf %139, %140 : vector<8x128xf32>
    %142 = arith.addf %141, %112 : vector<8x128xf32>
    %c7_66 = arith.constant 7 : index
    %c0_67 = arith.constant 0 : index
    %c0_68 = arith.constant 0 : index
    %143 = vector.load %arg3[%c7_66, %c0_67, %c0_68] : memref<16x8x128xf32, #tpu.memory_space<vmem>>, vector<1x8x128xf32>
    %144 = vector.shape_cast %143 : vector<1x8x128xf32> to vector<8x128xf32>
    %145 = vector.shape_cast %142 : vector<8x128xf32> to vector<1x8x128xf32>
    tpu.vector_store %arg3[%c7_66, %c0_67, %c0_68], %145 {strides = array<i32>} : memref<16x8x128xf32, #tpu.memory_space<vmem>>, vector<1x8x128xf32>,
    %c8_69 = arith.constant 8 : index
    %c0_70 = arith.constant 0 : index
    %c0_71 = arith.constant 0 : index
    %146 = vector.load %arg1[%c8_69, %c0_70, %c0_71] : memref<16x8x128xf32, #tpu.memory_space<vmem>>, vector<1x8x128xf32>
    %147 = vector.shape_cast %146 : vector<1x8x128xf32> to vector<8x128xf32>
    %c9 = arith.constant 9 : index
    %c0_72 = arith.constant 0 : index
    %c0_73 = arith.constant 0 : index
    %148 = vector.load %arg1[%c9, %c0_72, %c0_73] : memref<16x8x128xf32, #tpu.memory_space<vmem>>, vector<1x8x128xf32>
    %149 = vector.shape_cast %148 : vector<1x8x128xf32> to vector<8x128xf32>
    %c10 = arith.constant 10 : index
    %c0_74 = arith.constant 0 : index
    %c0_75 = arith.constant 0 : index
    %150 = vector.load %arg1[%c10, %c0_74, %c0_75] : memref<16x8x128xf32, #tpu.memory_space<vmem>>, vector<1x8x128xf32>
    %151 = vector.shape_cast %150 : vector<1x8x128xf32> to vector<8x128xf32>
    %c11 = arith.constant 11 : index
    %c0_76 = arith.constant 0 : index
    %c0_77 = arith.constant 0 : index
    %152 = vector.load %arg1[%c11, %c0_76, %c0_77] : memref<16x8x128xf32, #tpu.memory_space<vmem>>, vector<1x8x128xf32>
    %153 = vector.shape_cast %152 : vector<1x8x128xf32> to vector<8x128xf32>
    %154 = arith.mulf %147, %30 : vector<8x128xf32>
    %155 = arith.mulf %149, %52 : vector<8x128xf32>
    %156 = arith.addf %154, %155 : vector<8x128xf32>
    %157 = arith.mulf %151, %57 : vector<8x128xf32>
    %158 = arith.addf %156, %157 : vector<8x128xf32>
    %c8_78 = arith.constant 8 : index
    %c0_79 = arith.constant 0 : index
    %c0_80 = arith.constant 0 : index
    %159 = vector.load %arg3[%c8_78, %c0_79, %c0_80] : memref<16x8x128xf32, #tpu.memory_space<vmem>>, vector<1x8x128xf32>
    %160 = vector.shape_cast %159 : vector<1x8x128xf32> to vector<8x128xf32>
    %161 = vector.shape_cast %158 : vector<8x128xf32> to vector<1x8x128xf32>
    tpu.vector_store %arg3[%c8_78, %c0_79, %c0_80], %161 {strides = array<i32>} : memref<16x8x128xf32, #tpu.memory_space<vmem>>, vector<1x8x128xf32>,
    %162 = arith.mulf %147, %31 : vector<8x128xf32>
    %163 = arith.mulf %149, %53 : vector<8x128xf32>
    %164 = arith.addf %162, %163 : vector<8x128xf32>
    %165 = arith.mulf %151, %60 : vector<8x128xf32>
    %166 = arith.addf %164, %165 : vector<8x128xf32>
    %c9_81 = arith.constant 9 : index
    %c0_82 = arith.constant 0 : index
    %c0_83 = arith.constant 0 : index
    %167 = vector.load %arg3[%c9_81, %c0_82, %c0_83] : memref<16x8x128xf32, #tpu.memory_space<vmem>>, vector<1x8x128xf32>
    %168 = vector.shape_cast %167 : vector<1x8x128xf32> to vector<8x128xf32>
    %169 = vector.shape_cast %166 : vector<8x128xf32> to vector<1x8x128xf32>
    tpu.vector_store %arg3[%c9_81, %c0_82, %c0_83], %169 {strides = array<i32>} : memref<16x8x128xf32, #tpu.memory_space<vmem>>, vector<1x8x128xf32>,
    %170 = arith.mulf %147, %32 : vector<8x128xf32>
    %171 = arith.mulf %149, %54 : vector<8x128xf32>
    %172 = arith.addf %170, %171 : vector<8x128xf32>
    %173 = arith.mulf %151, %63 : vector<8x128xf32>
    %174 = arith.addf %172, %173 : vector<8x128xf32>
    %c10_84 = arith.constant 10 : index
    %c0_85 = arith.constant 0 : index
    %c0_86 = arith.constant 0 : index
    %175 = vector.load %arg3[%c10_84, %c0_85, %c0_86] : memref<16x8x128xf32, #tpu.memory_space<vmem>>, vector<1x8x128xf32>
    %176 = vector.shape_cast %175 : vector<1x8x128xf32> to vector<8x128xf32>
    %177 = vector.shape_cast %174 : vector<8x128xf32> to vector<1x8x128xf32>
    tpu.vector_store %arg3[%c10_84, %c0_85, %c0_86], %177 {strides = array<i32>} : memref<16x8x128xf32, #tpu.memory_space<vmem>>, vector<1x8x128xf32>,
    %178 = arith.mulf %147, %1 : vector<8x128xf32>
    %179 = arith.mulf %149, %3 : vector<8x128xf32>
    %180 = arith.addf %178, %179 : vector<8x128xf32>
    %181 = arith.mulf %151, %5 : vector<8x128xf32>
    %182 = arith.addf %180, %181 : vector<8x128xf32>
    %183 = arith.addf %182, %153 : vector<8x128xf32>
    %c11_87 = arith.constant 11 : index
    %c0_88 = arith.constant 0 : index
    %c0_89 = arith.constant 0 : index
    %184 = vector.load %arg3[%c11_87, %c0_88, %c0_89] : memref<16x8x128xf32, #tpu.memory_space<vmem>>, vector<1x8x128xf32>
    %185 = vector.shape_cast %184 : vector<1x8x128xf32> to vector<8x128xf32>
    %186 = vector.shape_cast %183 : vector<8x128xf32> to vector<1x8x128xf32>
    tpu.vector_store %arg3[%c11_87, %c0_88, %c0_89], %186 {strides = array<i32>} : memref<16x8x128xf32, #tpu.memory_space<vmem>>, vector<1x8x128xf32>,
    %c12 = arith.constant 12 : index
    %c0_90 = arith.constant 0 : index
    %c0_91 = arith.constant 0 : index
    %187 = vector.load %arg1[%c12, %c0_90, %c0_91] : memref<16x8x128xf32, #tpu.memory_space<vmem>>, vector<1x8x128xf32>
    %188 = vector.shape_cast %187 : vector<1x8x128xf32> to vector<8x128xf32>
    %c13 = arith.constant 13 : index
    %c0_92 = arith.constant 0 : index
    %c0_93 = arith.constant 0 : index
    %189 = vector.load %arg1[%c13, %c0_92, %c0_93] : memref<16x8x128xf32, #tpu.memory_space<vmem>>, vector<1x8x128xf32>
    %190 = vector.shape_cast %189 : vector<1x8x128xf32> to vector<8x128xf32>
    %c14 = arith.constant 14 : index
    %c0_94 = arith.constant 0 : index
    %c0_95 = arith.constant 0 : index
    %191 = vector.load %arg1[%c14, %c0_94, %c0_95] : memref<16x8x128xf32, #tpu.memory_space<vmem>>, vector<1x8x128xf32>
    %192 = vector.shape_cast %191 : vector<1x8x128xf32> to vector<8x128xf32>
    %c15 = arith.constant 15 : index
    %c0_96 = arith.constant 0 : index
    %c0_97 = arith.constant 0 : index
    %193 = vector.load %arg1[%c15, %c0_96, %c0_97] : memref<16x8x128xf32, #tpu.memory_space<vmem>>, vector<1x8x128xf32>
    %194 = vector.shape_cast %193 : vector<1x8x128xf32> to vector<8x128xf32>
    %195 = arith.mulf %188, %30 : vector<8x128xf32>
    %196 = arith.mulf %190, %52 : vector<8x128xf32>
    %197 = arith.addf %195, %196 : vector<8x128xf32>
    %198 = arith.mulf %192, %57 : vector<8x128xf32>
    %199 = arith.addf %197, %198 : vector<8x128xf32>
    %c12_98 = arith.constant 12 : index
    %c0_99 = arith.constant 0 : index
    %c0_100 = arith.constant 0 : index
    %200 = vector.load %arg3[%c12_98, %c0_99, %c0_100] : memref<16x8x128xf32, #tpu.memory_space<vmem>>, vector<1x8x128xf32>
    %201 = vector.shape_cast %200 : vector<1x8x128xf32> to vector<8x128xf32>
    %202 = vector.shape_cast %199 : vector<8x128xf32> to vector<1x8x128xf32>
    tpu.vector_store %arg3[%c12_98, %c0_99, %c0_100], %202 {strides = array<i32>} : memref<16x8x128xf32, #tpu.memory_space<vmem>>, vector<1x8x128xf32>,
    %203 = arith.mulf %188, %31 : vector<8x128xf32>
    %204 = arith.mulf %190, %53 : vector<8x128xf32>
    %205 = arith.addf %203, %204 : vector<8x128xf32>
    %206 = arith.mulf %192, %60 : vector<8x128xf32>
    %207 = arith.addf %205, %206 : vector<8x128xf32>
    %c13_101 = arith.constant 13 : index
    %c0_102 = arith.constant 0 : index
    %c0_103 = arith.constant 0 : index
    %208 = vector.load %arg3[%c13_101, %c0_102, %c0_103] : memref<16x8x128xf32, #tpu.memory_space<vmem>>, vector<1x8x128xf32>
    %209 = vector.shape_cast %208 : vector<1x8x128xf32> to vector<8x128xf32>
    %210 = vector.shape_cast %207 : vector<8x128xf32> to vector<1x8x128xf32>
    tpu.vector_store %arg3[%c13_101, %c0_102, %c0_103], %210 {strides = array<i32>} : memref<16x8x128xf32, #tpu.memory_space<vmem>>, vector<1x8x128xf32>,
    %211 = arith.mulf %188, %32 : vector<8x128xf32>
    %212 = arith.mulf %190, %54 : vector<8x128xf32>
    %213 = arith.addf %211, %212 : vector<8x128xf32>
    %214 = arith.mulf %192, %63 : vector<8x128xf32>
    %215 = arith.addf %213, %214 : vector<8x128xf32>
    %c14_104 = arith.constant 14 : index
    %c0_105 = arith.constant 0 : index
    %c0_106 = arith.constant 0 : index
    %216 = vector.load %arg3[%c14_104, %c0_105, %c0_106] : memref<16x8x128xf32, #tpu.memory_space<vmem>>, vector<1x8x128xf32>
    %217 = vector.shape_cast %216 : vector<1x8x128xf32> to vector<8x128xf32>
    %218 = vector.shape_cast %215 : vector<8x128xf32> to vector<1x8x128xf32>
    tpu.vector_store %arg3[%c14_104, %c0_105, %c0_106], %218 {strides = array<i32>} : memref<16x8x128xf32, #tpu.memory_space<vmem>>, vector<1x8x128xf32>,
    %219 = arith.mulf %188, %1 : vector<8x128xf32>
    %220 = arith.mulf %190, %3 : vector<8x128xf32>
    %221 = arith.addf %219, %220 : vector<8x128xf32>
    %222 = arith.mulf %192, %5 : vector<8x128xf32>
    %223 = arith.addf %221, %222 : vector<8x128xf32>
    %224 = arith.addf %223, %194 : vector<8x128xf32>
    %c15_107 = arith.constant 15 : index
    %c0_108 = arith.constant 0 : index
    %c0_109 = arith.constant 0 : index
    %225 = vector.load %arg3[%c15_107, %c0_108, %c0_109] : memref<16x8x128xf32, #tpu.memory_space<vmem>>, vector<1x8x128xf32>
    %226 = vector.shape_cast %225 : vector<1x8x128xf32> to vector<8x128xf32>
    %227 = vector.shape_cast %224 : vector<8x128xf32> to vector<1x8x128xf32>
    tpu.vector_store %arg3[%c15_107, %c0_108, %c0_109], %227 {strides = array<i32>} : memref<16x8x128xf32, #tpu.memory_space<vmem>>, vector<1x8x128xf32>,
    return
  }
  func.func @transform_0(%arg0: i32) -> (i32, i32, i32) {
    %c0_i32 = arith.constant 0 : i32
    %c0_i32_0 = arith.constant 0 : i32
    %c0_i32_1 = arith.constant 0 : i32
    return %c0_i32, %arg0, %c0_i32_0 : i32, i32, i32
  }
  func.func @transform_1(%arg0: i32) -> (i32, i32, i32) {
    %c0_i32 = arith.constant 0 : i32
    %c0_i32_0 = arith.constant 0 : i32
    %c0_i32_1 = arith.constant 0 : i32
    return %c0_i32, %arg0, %c0_i32_0 : i32, i32, i32
  }
  func.func @transform_2(%arg0: i32) -> (i32, i32, i32) {
    %c0_i32 = arith.constant 0 : i32
    %c0_i32_0 = arith.constant 0 : i32
    %c0_i32_1 = arith.constant 0 : i32
    return %c0_i32, %arg0, %c0_i32_0 : i32, i32, i32
  }
}

</mosaic_0001>

<bundles_post_ra>
// kernel: tpu_custom_call.1
= control target key start
LH: loop header
LB: loop body
LE: loop exit
PB: predicated region body
PF: predicated region fallthrough
CT: control target
= control target key end

     0   :  { %7 = vsyncpa [#allocation3], 0  ;;  %s461_s0 = inlined_call_operand.hbm [shape: f32[16,8,128], index: 0, kind: input, shape index: {}]   ;;  %s462_s1 = inlined_call_operand.hbm [shape: f32[9,8,128], index: 1, kind: input, shape index: {}]   ;;  %s463_s2 = inlined_call_operand.hbm [shape: f32[16,8,128], index: 2, kind: output, shape index: {}]  }
   0x1   :  { %8 = vsyncpa [#allocation6], 0 }
   0x2   :  { %9 = vsyncpa [#allocation4], 0  ;;  %s338_s9 = smov [#allocation2]  }
   0x3   :  { %s15_s10 = sshll.u32 %s338_s9, 4  ;;  %s16_s10 = int_to_ptr.vmem [resolvable:$true] %s15_s10 }
   0x4   :  { %s280_s11 = scalar_lea.vmem %s16_s10, 2048  ;;  %p285_p1 = scmp.lt.s32.totalorder %s16_s10, %s16_s10 }
   0x5   :  { %p281_p0 = scmp.ne.s32.totalorder %s16_s10, %s280_s11  ;;  %p286_p2 = scmp.lt.s32.totalorder %s280_s11, %s280_s11 }
   0x7   :  { %p287_p3 = por %p286_p2, %p285_p1 }
   0x9   :  { %p288_p4 = pnand %p287_p3, %p281_p0 }
   0xb   :  { %291 = shalt.err (!%p288_p4)
}
   0xc   :  { %s339_s12 = smov 128   ;;  %s340_s13 = smov 8  }
   0xd   :  { %21 = dma.hbm_to_vmem [thread:$0]  %s461_s0, 2048, %s16_s10, [#allocation3], %s339_s12, %s339_s12, %s340_s13  }
   0xe   :  { %s341_s16 = smov [#allocation5]  }
   0xf   :  { %s27_s17 = sshll.u32 %s341_s16, 4  ;;  %s28_s17 = int_to_ptr.vmem [resolvable:$true] %s27_s17 }
  0x10   :  { %s300_s18 = scalar_lea.vmem %s28_s17, 1152  ;;  %p305_p6 = scmp.lt.s32.totalorder %s28_s17, %s28_s17 }
  0x11   :  { %p301_p5 = scmp.ne.s32.totalorder %s28_s17, %s300_s18  ;;  %p306_p7 = scmp.lt.s32.totalorder %s300_s18, %s300_s18 }
  0x13   :  { %p307_p8 = por %p306_p7, %p305_p6 }
  0x15   :  { %p308_p9 = pnand %p307_p8, %p301_p5 }
  0x17   :  { %311 = shalt.err (!%p308_p9)
}
  0x18   :  { %33 = dma.hbm_to_vmem [thread:$0]  %s462_s1, 1152, %s28_s17, [#allocation6], %s339_s12, %s339_s12, %s340_s13  }
  0x19   :  { %332 = dma.done.wait [#allocation3], 2048  }
  0x1a   :  { %333 = vsyncadd [#allocation3], 4294965248 }
  0x1b   :  { %334 = dma.done.wait [#allocation6], 1152  }
  0x1c   :  { %335 = vsyncadd [#allocation6], 4294966144  ;;  %v46_v0 = vld [vmem:[#allocation5 + $0x18] sm:$0xff]  ;;  %v370_v1 = vld [vmem:[#allocation5 + $0x20] sm:$0xff]  ;;  %s342_s0 = smov [#allocation7]  }
  0x1d   :  { %v372_v2 = vld [vmem:[#allocation5 + $0x28] sm:$0xff]  ;;  %v47_v3 = vadd.f32 1.0, %v46_v0  ;;  %v60_v4 = vmul.f32 %v370_v1, %v370_v1  ;;  %v376_v5 = vld [vmem:[#allocation2] sm:$0xff]  ;;  %v380_v7 = vld [vmem:[#allocation2 + $0x10] sm:$0xff]  ;;  %s250_s1 = sshll.u32 %s342_s0, 4  ;;  %s251_s1 = int_to_ptr.vmem [resolvable:$true] %s250_s1 }
  0x1e   :  { %v378_v6 = vld [vmem:[#allocation2 + $0x8] sm:$0xff]  ;;  %v62_v9 = vmul.f32 %v372_v2, %v372_v2  ;;  %v40_v10 = vld [vmem:[#allocation5] sm:$0xff]  ;;  %v44_v12 = vld [vmem:[#allocation5 + $0x10] sm:$0xff]  ;;  %s312_s21 = scalar_lea.vmem %s251_s1, 2048  ;;  %p317_p11 = scmp.lt.s32.totalorder %s251_s1, %s251_s1 }
  0x1f   :  { %v59_v8 = vmul.f32 %v47_v3, %v47_v3  ;;  %v42_v11 = vld [vmem:[#allocation5 + $0x8] sm:$0xff]  ;;  %v126_v13 = vmul.f32 %v376_v5, %v40_v10  ;;  %v129_v15 = vmul.f32 %v380_v7, %v44_v12  ;;  %v387_v16 = vld [vmem:[#allocation2 + $0x20] sm:$0xff]  ;;  %v391_v19 = vld [vmem:[#allocation2 + $0x30] sm:$0xff]  ;;  %p313_p10 = scmp.ne.s32.totalorder %s251_s1, %s312_s21  ;;  %p318_p12 = scmp.lt.s32.totalorder %s312_s21, %s312_s21 }
  0x20   :  { %v127_v14 = vmul.f32 %v378_v6, %v42_v11  ;;  %v389_v17 = vld [vmem:[#allocation2 + $0x28] sm:$0xff]  ;;  %v163_v20 = vmul.f32 %v387_v16, %v40_v10  ;;  %v395_v22 = vld [vmem:[#allocation2 + $0x40] sm:$0xff]  ;;  %v105_v23 = vld [vmem:[#allocation2 + $0x18] sm:$0xff]  ;;  %v166_v25 = vmul.f32 %v391_v19, %v44_v12 }
  0x21   :  { %v61_v18 = vadd.f32 %v60_v4, %v59_v8  ;;  %v164_v21 = vmul.f32 %v389_v17, %v42_v11  ;;  %v398_v26 = vld [vmem:[#allocation2 + $0x48] sm:$0xff]  ;;  %v400_v27 = vld [vmem:[#allocation2 + $0x50] sm:$0xff]  ;;  %v200_v28 = vmul.f32 %v395_v22, %v40_v10  ;;  %v405_v33 = vld [vmem:[#allocation2 + $0x60] sm:$0xff]  ;;  %p319_p13 = por %p318_p12, %p317_p11 }
  0x22   :  { %v128_v24 = vadd.f32 %v127_v14, %v126_v13  ;;  %v201_v31 = vmul.f32 %v398_v26, %v42_v11  ;;  %v203_v32 = vmul.f32 %v400_v27, %v44_v12  ;;  %v407_v34 = vld [vmem:[#allocation2 + $0x68] sm:$0xff]  ;;  %v409_v35 = vld [vmem:[#allocation2 + $0x70] sm:$0xff]  ;;  %v141_v37 = vld [vmem:[#allocation2 + $0x38] sm:$0xff]  ;;  %v237_v38 = vmul.f32 %v405_v33, %v40_v10 }
  0x23   :  { %v63_v29 = vadd.f32 %v62_v9, %v61_v18  ;;  %v165_v30 = vadd.f32 %v164_v21, %v163_v20  ;;  %v238_v39 = vmul.f32 %v407_v34, %v42_v11  ;;  %v240_v40 = vmul.f32 %v409_v35, %v44_v12  ;;  %v178_v45 = vld [vmem:[#allocation2 + $0x58] sm:$0xff]  ;;  %v53_v56 = vld [vmem:[#allocation5 + $0x30] sm:$0xff]  ;;  %v58_v57 = vld [vmem:[#allocation5 + $0x40] sm:$0xff]  ;;  %p320_p0 = pnand %p319_p13, %p313_p10 }
  0x24   :  { %v130_v36 = vadd.f32 %v129_v15, %v128_v24  ;;  %v202_v43 = vadd.f32 %v201_v31, %v200_v28  ;;  %v215_v49 = vld [vmem:[#allocation2 + $0x78] sm:$0xff] }
  0x25   :  { %v64_v41 = vmax.f32 %v63_v29, 1e-24  ;;  %v167_v42 = vadd.f32 %v166_v25, %v165_v30  ;;  %v239_v46 = vadd.f32 %v238_v39, %v237_v38  ;;  %v55_v53 = vld [vmem:[#allocation5 + $0x38] sm:$0xff] }
  0x26   :  { %v131_v44 = vadd.f32 %v130_v36, %v105_v23  ;;  %v204_v48 = vadd.f32 %v203_v32, %v202_v43  ;;  %v56_v54 = vadd.f32 1.0, %v55_v53 }
  0x27   :  { %268 = vrsqrt.f32 %v64_v41  ;;  %v168_v47 = vadd.f32 %v167_v42, %v141_v37  ;;  %v241_v50 = vadd.f32 %v240_v40, %v239_v46 }
  0x28   :  { %133 = vst [vmem:[#allocation7 + $0x18] sm:$0xff] %v131_v44  ;;  %v205_v51 = vadd.f32 %v204_v48, %v178_v45 }
  0x29   :  { %170 = vst [vmem:[#allocation7 + $0x38] sm:$0xff] %v168_v47  ;;  %v242_v52 = vadd.f32 %v241_v50, %v215_v49 }
  0x2a   :  { %207 = vst [vmem:[#allocation7 + $0x58] sm:$0xff] %v205_v51 }
  0x2b   :  { %244 = vst [vmem:[#allocation7 + $0x78] sm:$0xff] %v242_v52 }
  0x34   :  { %v269_v55 = vpop.eup %268 }
  0x35   :  { %v66_v58 = vmul.f32 %v269_v55, %v47_v3  ;;  %v67_v59 = vmul.f32 %v269_v55, %v370_v1  ;;  %v68_v60 = vmul.f32 %v269_v55, %v372_v2 }
  0x37   :  { %v69_v61 = vmul.f32 %v66_v58, %v53_v56  ;;  %v70_v62 = vmul.f32 %v67_v59, %v56_v54  ;;  %v72_v63 = vmul.f32 %v68_v60, %v58_v57  ;;  %v106_v1 = vmul.f32 %v376_v5, %v66_v58 }
  0x38   :  { %v112_v2 = vmul.f32 %v376_v5, %v67_v59  ;;  %v119_v23 = vmul.f32 %v376_v5, %v68_v60  ;;  %v142_v25 = vmul.f32 %v387_v16, %v66_v58  ;;  %v149_v28 = vmul.f32 %v387_v16, %v67_v59 }
  0x39   :  { %v71_v0 = vadd.f32 %v70_v62, %v69_v61  ;;  %v156_v29 = vmul.f32 %v387_v16, %v68_v60  ;;  %v179_v30 = vmul.f32 %v395_v22, %v66_v58  ;;  %v186_v37 = vmul.f32 %v395_v22, %v67_v59 }
  0x3a   :  { %v193_v38 = vmul.f32 %v395_v22, %v68_v60  ;;  %v216_v39 = vmul.f32 %v405_v33, %v66_v58  ;;  %v223_v5 = vmul.f32 %v405_v33, %v67_v59  ;;  %v428_v40 = vmul.f32 %v405_v33, %v68_v60 }
  0x3b   :  { %v73_v4 = vadd.f32 %v72_v63, %v71_v0 }
  0x3d   :  { %v74_v8 = vmul.f32 %v73_v4, %v66_v58  ;;  %v76_v9 = vmul.f32 %v73_v4, %v67_v59  ;;  %v78_v10 = vmul.f32 %v73_v4, %v68_v60 }
  0x3f   :  { %v75_v11 = vsub.f32 %v53_v56, %v74_v8  ;;  %v77_v12 = vsub.f32 %v56_v54, %v76_v9  ;;  %v79_v13 = vsub.f32 %v58_v57, %v78_v10 }
  0x41   :  { %v80_v14 = vmul.f32 %v75_v11, %v75_v11  ;;  %v81_v15 = vmul.f32 %v77_v12, %v77_v12  ;;  %v83_v18 = vmul.f32 %v79_v13, %v79_v13 }
  0x43   :  { %v82_v20 = vadd.f32 %v81_v15, %v80_v14 }
  0x45   :  { %v84_v3 = vadd.f32 %v83_v18, %v82_v20 }
  0x47   :  { %v85_v21 = vmax.f32 %v84_v3, 1e-24 }
  0x49   :  { %270 = vrsqrt.f32 %v85_v21 }
  0x56   :  { %v271_v24 = vpop.eup %270 }
  0x57   :  { %v87_v31 = vmul.f32 %v271_v24, %v75_v11  ;;  %v88_v32 = vmul.f32 %v271_v24, %v77_v12  ;;  %v89_v36 = vmul.f32 %v271_v24, %v79_v13 }
  0x59   :  { %v90_v41 = vmul.f32 %v89_v36, %v67_v59  ;;  %v91_v42 = vmul.f32 %v88_v32, %v68_v60  ;;  %v107_v16 = vmul.f32 %v378_v6, %v87_v31  ;;  %v93_v43 = vmul.f32 %v87_v31, %v68_v60 }
  0x5a   :  { %v94_v44 = vmul.f32 %v89_v36, %v66_v58  ;;  %v113_v45 = vmul.f32 %v378_v6, %v88_v32  ;;  %v96_v46 = vmul.f32 %v88_v32, %v66_v58  ;;  %v97_v47 = vmul.f32 %v87_v31, %v67_v59 }
  0x5b   :  { %v92_v48 = vsub.f32 %v90_v41, %v91_v42  ;;  %v108_v49 = vadd.f32 %v107_v16, %v106_v1  ;;  %v120_v22 = vmul.f32 %v378_v6, %v89_v36  ;;  %v143_v50 = vmul.f32 %v389_v17, %v87_v31 }
  0x5c   :  { %v95_v51 = vsub.f32 %v93_v43, %v94_v44  ;;  %v114_v52 = vadd.f32 %v113_v45, %v112_v2  ;;  %v98_v33 = vsub.f32 %v96_v46, %v97_v47  ;;  %v150_v53 = vmul.f32 %v389_v17, %v88_v32 }
  0x5d   :  { %v109_v54 = vmul.f32 %v380_v7, %v92_v48  ;;  %v121_v55 = vadd.f32 %v120_v22, %v119_v23  ;;  %v144_v56 = vadd.f32 %v143_v50, %v142_v25  ;;  %v145_v57 = vmul.f32 %v391_v19, %v92_v48 }
  0x5e   :  { %v115_v58 = vmul.f32 %v380_v7, %v95_v51  ;;  %v122_v59 = vmul.f32 %v380_v7, %v98_v33  ;;  %v151_v60 = vadd.f32 %v150_v53, %v149_v28  ;;  %v152_v6 = vmul.f32 %v391_v19, %v95_v51 }
  0x5f   :  { %v110_v61 = vadd.f32 %v109_v54, %v108_v49  ;;  %v146_v62 = vadd.f32 %v145_v57, %v144_v56  ;;  %v157_v63 = vmul.f32 %v389_v17, %v89_v36  ;;  %v159_v0 = vmul.f32 %v391_v19, %v98_v33 }
  0x60   :  { %v116_v4 = vadd.f32 %v115_v58, %v114_v52  ;;  %v123_v8 = vadd.f32 %v122_v59, %v121_v55  ;;  %v153_v9 = vadd.f32 %v152_v6, %v151_v60  ;;  %v180_v10 = vmul.f32 %v398_v26, %v87_v31 }
  0x61   :  { %111 = vst [vmem:[#allocation7] sm:$0xff] %v110_v61  ;;  %148 = vst [vmem:[#allocation7 + $0x20] sm:$0xff] %v146_v62  ;;  %v158_v11 = vadd.f32 %v157_v63, %v156_v29  ;;  %v182_v12 = vmul.f32 %v400_v27, %v92_v48  ;;  %v187_v7 = vmul.f32 %v398_v26, %v88_v32 }
  0x62   :  { %v189_v13 = vmul.f32 %v400_v27, %v95_v51  ;;  %118 = vst [vmem:[#allocation7 + $0x8] sm:$0xff] %v116_v4  ;;  %125 = vst [vmem:[#allocation7 + $0x10] sm:$0xff] %v123_v8  ;;  %v181_v17 = vadd.f32 %v180_v10, %v179_v30  ;;  %v194_v19 = vmul.f32 %v398_v26, %v89_v36 }
  0x63   :  { %155 = vst [vmem:[#allocation7 + $0x28] sm:$0xff] %v153_v9  ;;  %v196_v14 = vmul.f32 %v400_v27, %v98_v33  ;;  %v217_v15 = vmul.f32 %v407_v34, %v87_v31  ;;  %v160_v18 = vadd.f32 %v159_v0, %v158_v11  ;;  %v188_v20 = vadd.f32 %v187_v7, %v186_v37 }
  0x64   :  { %v219_v3 = vmul.f32 %v409_v35, %v92_v48  ;;  %v224_v21 = vmul.f32 %v407_v34, %v88_v32  ;;  %v183_v1 = vadd.f32 %v182_v12, %v181_v17  ;;  %v195_v2 = vadd.f32 %v194_v19, %v193_v38 }
  0x65   :  { %v218_v23 = vadd.f32 %v217_v15, %v216_v39  ;;  %v226_v24 = vmul.f32 %v409_v35, %v95_v51  ;;  %162 = vst [vmem:[#allocation7 + $0x30] sm:$0xff] %v160_v18  ;;  %v190_v25 = vadd.f32 %v189_v13, %v188_v20  ;;  %v231_v26 = vmul.f32 %v407_v34, %v89_v36 }
  0x66   :  { %v225_v28 = vadd.f32 %v224_v21, %v223_v5  ;;  %v233_v27 = vmul.f32 %v409_v35, %v98_v33  ;;  %185 = vst [vmem:[#allocation7 + $0x40] sm:$0xff] %v183_v1  ;;  %v197_v29 = vadd.f32 %v196_v14, %v195_v2 }
  0x67   :  { %v220_v30 = vadd.f32 %v219_v3, %v218_v23  ;;  %192 = vst [vmem:[#allocation7 + $0x48] sm:$0xff] %v190_v25  ;;  %v232_v32 = vadd.f32 %v231_v26, %v428_v40 }
  0x68   :  { %v227_v31 = vadd.f32 %v226_v24, %v225_v28  ;;  %199 = vst [vmem:[#allocation7 + $0x50] sm:$0xff] %v197_v29 }
  0x69   :  { %222 = vst [vmem:[#allocation7 + $0x60] sm:$0xff] %v220_v30  ;;  %v234_v37 = vadd.f32 %v233_v27, %v232_v32 }
  0x6a   :  { %229 = vst [vmem:[#allocation7 + $0x68] sm:$0xff] %v227_v31 }
  0x6b   :  { %236 = vst [vmem:[#allocation7 + $0x70] sm:$0xff] %v234_v37 }
  0x6c   :  { %323 = shalt.err (!%p320_p0)
}
  0x6d   :  { %256 = dma.vmem_to_hbm [thread:$0]  %s251_s1, 2048, %s463_s2, [#allocation4], %s339_s12, %s339_s12, %s340_s13  }
  0x6e   :  { %336 = dma.done.wait [#allocation4], 2048  }
  0x6f   :  { %337 = vsyncadd [#allocation4], 4294965248 }
  0x70   :  { %260 = vsyncpa [#allocation3], 1 }
  0x71   :  { %261 = vsyncpa [#allocation6], 1 }
  0x72   :  { %262 = vsyncpa [#allocation4], 1 }

</bundles_post_ra>
